<compile_context>
chip_gen: v7x
topology: tpu7x:2x2x1
jax: 0.10.0
libtpu: 0.0.40
codegen_flags: <defaults>
</compile_context>

<pallas_src>
import jax
import jax.numpy as jnp
from jax.experimental import pallas as pl
from jax.experimental.pallas import tpu as pltpu


def _make_norm_permute_kernel(scale, bias):
    """Kernel closing over per-channel affine constants (Python floats)."""
    C = len(scale)

    def kernel(x_ref, out_ntc_ref, out_nct_ref):
        # x_ref:       (1, TM, C, HWT)  input tile ([B, T, C, HW] layout)
        # out_ntc_ref: (1, TM, C, HWT)  normalized videos, same layout as input
        # out_nct_ref: (1, C, TM, HWT)  fused permute -> [B, C, T, HW] layout
        for c in range(C):                       # C is small & static -> fully unrolled
            xc = x_ref[0, :, c, :]               # (TM, HWT) dense sublane x lane tile
            yc = xc * scale[c] + bias[c]         # mult-add on the VPU (no divide)
            out_ntc_ref[0, :, c, :] = yc
            out_nct_ref[0, c, :, :] = yc

    return kernel


def _choose_tiles(T, HW, C, vmem_budget_bytes=8 * 1024 * 1024):
    """Pick (TM frames, HWT spatial lanes) per block under a VMEM budget.

    Budget model (f32, double-buffered): input tile and NTCHW output tile pad the
    C axis to a multiple of 8 sublanes; the NCTHW output tile holds ~C dense rows.
    Legality: TM is either == T or a multiple of 8; HWT is either == HW or a
    multiple of 128 (lane-dense, unmasked stores).
    """
    pad_c = -(-C // 8) * 8
    per_elem_bytes = (2 * pad_c + C) * 4 * 2          # per (frame-row, lane) element
    budget = max(vmem_budget_bytes // per_elem_bytes, 8 * 128)

    if T * HW <= budget:                              # whole [T, C, HW] slab per batch elem
        return T, HW
    if HW <= budget and budget // HW >= 8:            # whole frames, many per block
        tm = budget // HW
        tm = T if tm >= T else (tm // 8) * 8
        return tm, HW
    # chunk the spatial axis in lane-dense (multiple-of-128) pieces
    tm = T if T <= 8 else 8
    hwt = min(HW, (budget // tm) // 128 * 128)
    hwt = max(hwt, 128)
    return tm, hwt


def normalize_and_permute(videos, scale, bias, *, vmem_budget_bytes=8 * 1024 * 1024):
    """Fused: normed = videos * scale + bias  (== (videos - mean) / std)
              backbone_input = normed.transpose(0, 2, 1, 3, 4)

    videos: [B, T, C, H, W] float32
    scale, bias: length-C tuples of Python floats (compile-time constants)
    returns: (normed [B,T,C,H,W], backbone_input [B,C,T,H,W])
    """
    B, T, C, H, W = videos.shape
    HW = H * W
    x = videos.astype(jnp.float32).reshape(B, T, C, HW)   # free reshape (merge trailing dims)

    tm, hwt = _choose_tiles(T, HW, C, vmem_budget_bytes)
    grid = (B, pl.cdiv(T, tm), pl.cdiv(HW, hwt))

    kernel = _make_norm_permute_kernel(tuple(scale), tuple(bias))

    normed_flat, permuted_flat = pl.pallas_call(
        kernel,
        out_shape=(
            jax.ShapeDtypeStruct((B, T, C, HW), jnp.float32),   # normalized (NTCHW)
            jax.ShapeDtypeStruct((B, C, T, HW), jnp.float32),   # fused permute (NCTHW)
        ),
        grid_spec=pltpu.PrefetchScalarGridSpec(
            num_scalar_prefetch=0,
            grid=grid,
            in_specs=[
                pl.BlockSpec((1, tm, C, hwt), lambda b, tb, hb: (b, tb, 0, hb)),
            ],
            out_specs=[
                pl.BlockSpec((1, tm, C, hwt), lambda b, tb, hb: (b, tb, 0, hb)),
                pl.BlockSpec((1, C, tm, hwt), lambda b, tb, hb: (b, 0, tb, hb)),
            ],
        ),
        compiler_params=pltpu.CompilerParams(
            dimension_semantics=("parallel", "parallel", "parallel"),
        ),
    )(x)

    normed = normed_flat.reshape(B, T, C, H, W)
    backbone_input = permuted_flat.reshape(B, C, T, H, W)
    return normed, backbone_input


class BackboneEncoderDecoderPallas:
    """JAX/Pallas port of the concrete compute in BackboneEncoderDecoder.forward.

    Only the module-local math is implemented: pixel normalization and the
    permute(0,2,1,3,4) fed into model_preds(). Registry-based submodules are external.
    """

    def __init__(self,
                 pixel_mean=(0.485, 0.456, 0.406),
                 pixel_std=(0.229, 0.224, 0.225)):
        self.pixel_mean = jnp.asarray(pixel_mean, dtype=jnp.float32)
        self.pixel_std = jnp.asarray(pixel_std, dtype=jnp.float32)
        # pixel_mean/std are fixed (non-trainable) buffers -> bake the affine form:
        #   (x - m) / s  ==  x * (1/s) + (-m/s)
        self._scale = tuple(float(1.0 / s) for s in pixel_std)
        self._bias = tuple(float(-m / s) for m, s in zip(pixel_mean, pixel_std))

    def forward(self, videos):
        # videos: [B, T, C, H, W]
        normed, backbone_input = normalize_and_permute(videos, self._scale, self._bias)
        # TODO(synk): self.model_preds (video_backbone -> fusion_encoder -> decoder) and
        #             decoder.compute_loss require registry submodules not defined here.
        return normed, backbone_input


if __name__ == "__main__":
    key = jax.random.PRNGKey(0)
    B, T, C, H, W = 2, 8, 3, 16, 16
    videos = jax.random.uniform(key, (B, T, C, H, W), dtype=jnp.float32)

    model = BackboneEncoderDecoderPallas()
    normed, backbone_input = model.forward(videos)
    normed = jax.block_until_ready(normed)
    backbone_input = jax.block_until_ready(backbone_input)

    # reference: exact PyTorch semantics (videos - mean.view(-1,1,1)) / std.view(-1,1,1)
    mean_ref = model.pixel_mean.reshape(1, 1, C, 1, 1)
    std_ref = model.pixel_std.reshape(1, 1, C, 1, 1)
    expected = (videos - mean_ref) / std_ref

    assert normed.shape == (B, T, C, H, W)
    assert backbone_input.shape == (B, C, T, H, W)
    # mult-add form differs from subtract-then-divide by ~a few ULPs only
    assert jnp.allclose(normed, expected, atol=3e-5, rtol=3e-5)
    assert jnp.allclose(backbone_input, jnp.transpose(expected, (0, 2, 1, 3, 4)),
                        atol=3e-5, rtol=3e-5)

    print("KERNEL_OK")
</pallas_src>

<mosaic_0001>
module attributes {stable_mosaic.version = 11 : i64} {
  func.func @kernel(%arg0: i32, %arg1: i32, %arg2: i32, %arg3: memref<1x8x3x256xf32, #tpu.memory_space<vmem>>, %arg4: memref<1x8x3x256xf32, #tpu.memory_space<vmem>>, %arg5: memref<1x3x8x256xf32, #tpu.memory_space<vmem>>) attributes {dimension_semantics = [#tpu.dimension_semantics<parallel>, #tpu.dimension_semantics<parallel>, #tpu.dimension_semantics<parallel>], iteration_bounds = array<i64: 2, 1, 1>, scalar_prefetch = 0 : i64, scratch_operands = 0 : i64, tpu.core_type = #tpu.core_type<tc>, window_params = [{transform_indices = @transform_0, window_bounds = array<i64: 1, 8, 3, 256>}, {transform_indices = @transform_1, window_bounds = array<i64: 1, 8, 3, 256>}, {transform_indices = @transform_2, window_bounds = array<i64: 1, 3, 8, 256>}]} {
    %c0 = arith.constant 0 : index
    %c0_0 = arith.constant 0 : index
    %c0_1 = arith.constant 0 : index
    %c0_2 = arith.constant 0 : index
    %0 = vector.load %arg3[%c0, %c0_0, %c0_1, %c0_2] : memref<1x8x3x256xf32, #tpu.memory_space<vmem>>, vector<1x8x1x256xf32>
    %1 = vector.shape_cast %0 : vector<1x8x1x256xf32> to vector<8x256xf32>
    %cst = arith.constant 4.36681223 : f32
    %2 = vector.broadcast %cst : f32 to vector<8x256xf32>
    %3 = arith.mulf %1, %2 : vector<8x256xf32>
    %cst_3 = arith.constant -2.11790395 : f32
    %4 = vector.broadcast %cst_3 : f32 to vector<8x256xf32>
    %5 = arith.addf %3, %4 : vector<8x256xf32>
    %c0_4 = arith.constant 0 : index
    %c0_5 = arith.constant 0 : index
    %c0_6 = arith.constant 0 : index
    %c0_7 = arith.constant 0 : index
    %6 = vector.load %arg4[%c0_4, %c0_5, %c0_6, %c0_7] : memref<1x8x3x256xf32, #tpu.memory_space<vmem>>, vector<1x8x1x256xf32>
    %7 = vector.shape_cast %6 : vector<1x8x1x256xf32> to vector<8x256xf32>
    %8 = vector.shape_cast %5 : vector<8x256xf32> to vector<1x8x1x256xf32>
    tpu.vector_store %arg4[%c0_4, %c0_5, %c0_6, %c0_7], %8 {strides = array<i32>} : memref<1x8x3x256xf32, #tpu.memory_space<vmem>>, vector<1x8x1x256xf32>,
    %c0_8 = arith.constant 0 : index
    %c0_9 = arith.constant 0 : index
    %c0_10 = arith.constant 0 : index
    %c0_11 = arith.constant 0 : index
    %9 = vector.load %arg5[%c0_8, %c0_9, %c0_10, %c0_11] : memref<1x3x8x256xf32, #tpu.memory_space<vmem>>, vector<1x1x8x256xf32>
    %10 = vector.shape_cast %9 : vector<1x1x8x256xf32> to vector<8x256xf32>
    %11 = vector.shape_cast %5 : vector<8x256xf32> to vector<1x1x8x256xf32>
    tpu.vector_store %arg5[%c0_8, %c0_9, %c0_10, %c0_11], %11 {strides = array<i32>} : memref<1x3x8x256xf32, #tpu.memory_space<vmem>>, vector<1x1x8x256xf32>,
    %c0_12 = arith.constant 0 : index
    %c0_13 = arith.constant 0 : index
    %c1 = arith.constant 1 : index
    %c0_14 = arith.constant 0 : index
    %12 = vector.load %arg3[%c0_12, %c0_13, %c1, %c0_14] : memref<1x8x3x256xf32, #tpu.memory_space<vmem>>, vector<1x8x1x256xf32>
    %13 = vector.shape_cast %12 : vector<1x8x1x256xf32> to vector<8x256xf32>
    %cst_15 = arith.constant 4.46428585 : f32
    %14 = vector.broadcast %cst_15 : f32 to vector<8x256xf32>
    %15 = arith.mulf %13, %14 : vector<8x256xf32>
    %cst_16 = arith.constant -2.03571439 : f32
    %16 = vector.broadcast %cst_16 : f32 to vector<8x256xf32>
    %17 = arith.addf %15, %16 : vector<8x256xf32>
    %c0_17 = arith.constant 0 : index
    %c0_18 = arith.constant 0 : index
    %c1_19 = arith.constant 1 : index
    %c0_20 = arith.constant 0 : index
    %18 = vector.load %arg4[%c0_17, %c0_18, %c1_19, %c0_20] : memref<1x8x3x256xf32, #tpu.memory_space<vmem>>, vector<1x8x1x256xf32>
    %19 = vector.shape_cast %18 : vector<1x8x1x256xf32> to vector<8x256xf32>
    %20 = vector.shape_cast %17 : vector<8x256xf32> to vector<1x8x1x256xf32>
    tpu.vector_store %arg4[%c0_17, %c0_18, %c1_19, %c0_20], %20 {strides = array<i32>} : memref<1x8x3x256xf32, #tpu.memory_space<vmem>>, vector<1x8x1x256xf32>,
    %c0_21 = arith.constant 0 : index
    %c1_22 = arith.constant 1 : index
    %c0_23 = arith.constant 0 : index
    %c0_24 = arith.constant 0 : index
    %21 = vector.load %arg5[%c0_21, %c1_22, %c0_23, %c0_24] : memref<1x3x8x256xf32, #tpu.memory_space<vmem>>, vector<1x1x8x256xf32>
    %22 = vector.shape_cast %21 : vector<1x1x8x256xf32> to vector<8x256xf32>
    %23 = vector.shape_cast %17 : vector<8x256xf32> to vector<1x1x8x256xf32>
    tpu.vector_store %arg5[%c0_21, %c1_22, %c0_23, %c0_24], %23 {strides = array<i32>} : memref<1x3x8x256xf32, #tpu.memory_space<vmem>>, vector<1x1x8x256xf32>,
    %c0_25 = arith.constant 0 : index
    %c0_26 = arith.constant 0 : index
    %c2 = arith.constant 2 : index
    %c0_27 = arith.constant 0 : index
    %24 = vector.load %arg3[%c0_25, %c0_26, %c2, %c0_27] : memref<1x8x3x256xf32, #tpu.memory_space<vmem>>, vector<1x8x1x256xf32>
    %25 = vector.shape_cast %24 : vector<1x8x1x256xf32> to vector<8x256xf32>
    %cst_28 = arith.constant 4.44444466 : f32
    %26 = vector.broadcast %cst_28 : f32 to vector<8x256xf32>
    %27 = arith.mulf %25, %26 : vector<8x256xf32>
    %cst_29 = arith.constant -1.80444443 : f32
    %28 = vector.broadcast %cst_29 : f32 to vector<8x256xf32>
    %29 = arith.addf %27, %28 : vector<8x256xf32>
    %c0_30 = arith.constant 0 : index
    %c0_31 = arith.constant 0 : index
    %c2_32 = arith.constant 2 : index
    %c0_33 = arith.constant 0 : index
    %30 = vector.load %arg4[%c0_30, %c0_31, %c2_32, %c0_33] : memref<1x8x3x256xf32, #tpu.memory_space<vmem>>, vector<1x8x1x256xf32>
    %31 = vector.shape_cast %30 : vector<1x8x1x256xf32> to vector<8x256xf32>
    %32 = vector.shape_cast %29 : vector<8x256xf32> to vector<1x8x1x256xf32>
    tpu.vector_store %arg4[%c0_30, %c0_31, %c2_32, %c0_33], %32 {strides = array<i32>} : memref<1x8x3x256xf32, #tpu.memory_space<vmem>>, vector<1x8x1x256xf32>,
    %c0_34 = arith.constant 0 : index
    %c2_35 = arith.constant 2 : index
    %c0_36 = arith.constant 0 : index
    %c0_37 = arith.constant 0 : index
    %33 = vector.load %arg5[%c0_34, %c2_35, %c0_36, %c0_37] : memref<1x3x8x256xf32, #tpu.memory_space<vmem>>, vector<1x1x8x256xf32>
    %34 = vector.shape_cast %33 : vector<1x1x8x256xf32> to vector<8x256xf32>
    %35 = vector.shape_cast %29 : vector<8x256xf32> to vector<1x1x8x256xf32>
    tpu.vector_store %arg5[%c0_34, %c2_35, %c0_36, %c0_37], %35 {strides = array<i32>} : memref<1x3x8x256xf32, #tpu.memory_space<vmem>>, vector<1x1x8x256xf32>,
    return
  }
  func.func @transform_0(%arg0: i32, %arg1: i32, %arg2: i32) -> (i32, i32, i32, i32) {
    %c0_i32 = arith.constant 0 : i32
    %c0_i32_0 = arith.constant 0 : i32
    return %arg0, %arg1, %c0_i32, %arg2 : i32, i32, i32, i32
  }
  func.func @transform_1(%arg0: i32, %arg1: i32, %arg2: i32) -> (i32, i32, i32, i32) {
    %c0_i32 = arith.constant 0 : i32
    %c0_i32_0 = arith.constant 0 : i32
    return %arg0, %arg1, %c0_i32, %arg2 : i32, i32, i32, i32
  }
  func.func @transform_2(%arg0: i32, %arg1: i32, %arg2: i32) -> (i32, i32, i32, i32) {
    %c0_i32 = arith.constant 0 : i32
    %c0_i32_0 = arith.constant 0 : i32
    return %arg0, %c0_i32, %arg1, %arg2 : i32, i32, i32, i32
  }
}

</mosaic_0001>

<bundles_post_ra>
// kernel: tpu_custom_call.1
= control target key start
LH: loop header
LB: loop body
LE: loop exit
PB: predicated region body
PF: predicated region fallthrough
CT: control target
= control target key end

     0   :  { %8 = vsyncpa [#allocation3], 0  ;;  %s1284_s0 = inlined_call_operand.vmem [shape: f32[2,8,3,256], index: 0, kind: input, shape index: {}]   ;;  %s1285_s1 = inlined_call_operand.vmem [shape: f32[2,8,3,256], index: 1, kind: output, shape index: {0}]   ;;  %s1286_s2 = inlined_call_operand.hbm [shape: f32[2,3,8,256], index: 2, kind: output, shape index: {1}]  }
   0x1   :  { %10 = vsyncpa [#allocation3 + $0x1], 0  ;;  %s1020_s9 = smov 0   ;;  %s1022_s10 = smov 0  }
   0x2   :  { %s1024_s11 = smov 0   ;;  %s1026_s12 = smov 0  }
   0x3   :  { %s1028_s13 = smov 0   ;;  %s1030_s14 = smov 0  }
   0x4 LB: > { %s797_s15 = sadd.s32 4294967295, %s999_s14   ;;  %s798_s16 = sadd.s32 4294967294, %s999_s14   ;;  %s999_s14 = sphi %s1030_s14, %s16_s14   ;;  %s995_s13 = sphi %s1028_s13, %s1295_s13   ;;  %s991_s12 = sphi %s1026_s12, %s1294_s12   ;;  %s987_s11 = sphi %s1024_s11, %s1293_s11   ;;  %s983_s10 = sphi %s1022_s10, %s1292_s10   ;;  %s979_s9 = sphi %s1020_s9, %s1291_s9  }
   0x5   : > { %s35_s17 = sadd.s32 1, %s995_s13  ;;  %s106_s18 = sadd.s32 1, %s987_s11 }
   0x6   : > { %p37_p0 = scmp.ge.s32.totalorder %s35_s17, 2  ;;  %p116_p1 = scmp.ne.s32.totalorder %s987_s11, %s983_s10 }
   0x7   : > { %p117_p2 = scmp.eq.s32.totalorder %s797_s15, 1  ;;  %p122_p3 = scmp.ne.s32.totalorder %s983_s10, %s979_s9 }
   0x8   : > { %s1297_s17 = smov (%p37_p0, %s35_s17), 0  ;;  %p123_p5 = scmp.eq.s32.totalorder %s798_s16, 1 }
   0x9   : > { %p1060_p4 = por %p117_p2, %p116_p1  ;;  %s99_s20 = ssub.s32 %s995_s13, %s1297_s17 }
   0xa   : > { %p801_p6 = scmp.ge.s32.totalorder %s999_s14, 1  ;;  %p104_p7 = scmp.eq.s32.totalorder %s99_s20, 0 }
   0xb   : > { %p1067_p8 = por %p123_p5, %p122_p3  ;;  %p160_p9 = scmp.lt.s32.totalorder %s999_s14, 3 }
   0xc   : > { %s1073_s22 = scalar_select %p104_p7, %s987_s11, %s106_s18  }
   0xd   : > { %p161_p10 = pnand %p801_p6, %p160_p9 }
   0xe   : > { %p207_p11 = scmp.lt.s32.totalorder (!%p161_p10), %s991_s12, 1  ;;  %v269_v0 = vlaneseq (!%p161_p10)  ;;  %v1001_v1 = vmov (!%p161_p10), 1966171168   ;;  %s202_s3 = sand.u32 (!%p161_p10), 1, %s983_s10  }
   0xf   : > { %164 = sbr.rel (%p161_p10) target bundleno = 90 (0x5a), region = 24  ;;  %v301_v2 = vunpack.c.l.s4 (!%p161_p10), %v1001_v1  ;;  %s1238_s16 = scalar_lea.sflag (!%p161_p10), [#allocation3], %s202_s3 }
  0x10   : > { %v304_v3 = vshrl.u32 (!%p161_p10), %v269_v0, 7  ;;  %vm1082_vm0 = vcmp.lt.s32.totalorder (!%p161_p10), %v269_v0, 256  ;;  %s1138_s4 = smul.u32 (!%p161_p10), 48, %s202_s3  ;;  %s1002_s20 = smov (!%p161_p10), [#allocation2]  }
  0x11   : > { %v302_v13 = vunpack.c.0.s8 (!%p161_p10), %v301_v2  ;;  %s862_s6 = smul.u32 (!%p161_p10), 768, %s991_s12 }
  0x12   : > { %s1160_s5 = scalar_lea.vmem (!%p161_p10), [#allocation2], %s1138_s4 }
  0x13   : > { %v1099_v26 = vsub.s32 (!%p161_p10), %v302_v13, %v304_v3  ;;  %s657_s7 = sshll.u32 (!%p161_p10), %s1160_s5, 4  ;;  %s1227_s7 = int_to_ptr.vmem [resolvable:$true] %s657_s7 }
  0x14   : > { %s921_s18 = scalar_lea.vmem (!%p161_p10), %s1227_s7, 768 }
  0x15   : > { %p922_p12 = scmp.ne.s32.totalorder (!%p161_p10), %s1227_s7, %s921_s18 }
  0x16   : > { %s208_s23 = scalar_select %p207_p11, %s991_s12, 1 }
  0x17   : > { %s1232_s12 = scalar_lea.hbm %s1286_s2, %s862_s6  ;;  %p923_p13 = pnand %p922_p12, %p1060_p4 }
  0x18   : > { %s859_s24 = sshll.u32 %s208_s23, 6  ;;  %s925_s23 = sshll.u32 %s1002_s20, 4  ;;  %s926_s23 = int_to_ptr.vmem [resolvable:$false] %s925_s23 }
  0x19   : > { %s1080_s27 = scalar_lea.vmem %s1284_s0, %s859_s24  ;;  %s1097_s30 = scalar_lea.vmem %s1285_s1, %s859_s24 }
  0x1a   : > { %v238_v5 = vld [vmem:[%s1080_s27] ss:$4 sm:$0x3]  ;;  %v806_v6 = vld [vmem:[%s1080_s27 + $0x8] ss:$4 sm:$0x3]  ;;  %p924_p0 = pneg %p923_p13  ;;  %p928_p1 = scmp.lt.s32.totalorder %s1227_s7, %s926_s23 }
  0x1b   : > { %v807_v7 = vld [vmem:[%s1080_s27 + $0x10] ss:$4 sm:$0x3]  ;;  %v808_v8 = vld [vmem:[%s1080_s27 + $0x18] ss:$4 sm:$0x3] }
  0x1c   : > { %v809_v9 = vld [vmem:[%s1080_s27 + $0x20] ss:$4 sm:$0x3]  ;;  %v810_v10 = vld [vmem:[%s1080_s27 + $0x28] ss:$4 sm:$0x3] }
  0x1d   : > { %v811_v11 = vld [vmem:[%s1080_s27 + $0x30] ss:$4 sm:$0x3]  ;;  %v812_v12 = vld [vmem:[%s1080_s27 + $0x38] ss:$4 sm:$0x3] }
  0x1e   : > { %v253_v14 = vmul.f32 4.366812, %v238_v5  ;;  %v254_v15 = vmul.f32 4.366812, %v806_v6  ;;  %v255_v16 = vmul.f32 4.366812, %v807_v7 }
  0x1f   : > { %v256_v17 = vmul.f32 4.366812, %v808_v8  ;;  %v257_v18 = vmul.f32 4.366812, %v809_v9  ;;  %v258_v19 = vmul.f32 4.366812, %v810_v10 }
  0x20   : > { %v259_v20 = vmul.f32 4.366812, %v811_v11  ;;  %v260_v21 = vmul.f32 4.366812, %v812_v12  ;;  %v261_v22 = vadd.f32 -2.117904, %v253_v14 }
  0x21   : > { %v262_v23 = vadd.f32 -2.117904, %v254_v15  ;;  %v263_v24 = vadd.f32 -2.117904, %v255_v16  ;;  %v264_v25 = vadd.f32 -2.117904, %v256_v17 }
  0x22   : > { %v265_v27 = vadd.f32 -2.117904, %v257_v18  ;;  %v266_v28 = vadd.f32 -2.117904, %v258_v19  ;;  %v267_v29 = vadd.f32 -2.117904, %v259_v20 }
  0x23   : > { %273 = vst.msk [vmem:[%s1097_s30] ss:$4 sm:$0x3] %vm1082_vm0, %v261_v22  ;;  %v268_v30 = vadd.f32 -2.117904, %v260_v21  ;;  %v296_v31 = vcombine.low %v261_v22, %v262_v23  ;;  %v297_v32 = vcombine.low %v263_v24, %v264_v25  ;;  %s927_s24 = scalar_lea.vmem %s926_s23, 1536 }
  0x24   : > { %v820_v33 = vld [vmem:[%s1080_s27 + $0x1] ss:$4 sm:$0x3]  ;;  %813 = vst.msk [vmem:[%s1097_s30 + $0x8] ss:$4 sm:$0x3] %vm1082_vm0, %v262_v23  ;;  %v298_v34 = vcombine.low %v265_v27, %v266_v28  ;;  %p929_p2 = scmp.lt.s32.totalorder %s927_s24, %s921_s18 }
  0x25   : > { %814 = vst.msk [vmem:[%s1097_s30 + $0x10] ss:$4 sm:$0x3] %vm1082_vm0, %v263_v24  ;;  %815 = vst.msk [vmem:[%s1097_s30 + $0x18] ss:$4 sm:$0x3] %vm1082_vm0, %v264_v25  ;;  %v299_v37 = vcombine.low %v267_v29, %v268_v30  ;;  %v306_v38 = vrot.slane %v296_v31, %v1099_v26  ;;  %v313_v39 = vrot.slane %v297_v32, %v1099_v26 }
  0x26   : > { %v821_v35 = vld [vmem:[%s1080_s27 + $0x9] ss:$4 sm:$0x3]  ;;  %v822_v36 = vld [vmem:[%s1080_s27 + $0x11] ss:$4 sm:$0x3]  ;;  %v320_v42 = vrot.slane %v298_v34, %v1099_v26  ;;  %p930_p3 = por %p929_p2, %p928_p1 }
  0x27   : > { %816 = vst.msk [vmem:[%s1097_s30 + $0x20] ss:$4 sm:$0x3] %vm1082_vm0, %v265_v27  ;;  %817 = vst.msk [vmem:[%s1097_s30 + $0x28] ss:$4 sm:$0x3] %vm1082_vm0, %v266_v28  ;;  %v327_v45 = vrot.slane %v299_v37, %v1099_v26  ;;  %v328_v46 = vcombine.low %v306_v38, %v313_v39  ;;  %v329_v47 = vcombine.high %v306_v38, %v313_v39 }
  0x28   : > { %818 = vst.msk [vmem:[%s1097_s30 + $0x30] ss:$4 sm:$0x3] %vm1082_vm0, %v267_v29  ;;  %v823_v40 = vld [vmem:[%s1080_s27 + $0x19] ss:$4 sm:$0x3]  ;;  %p931_p5 = pnand %p930_p3, %p924_p0 }
  0x29   : > { %v824_v41 = vld [vmem:[%s1080_s27 + $0x21] ss:$4 sm:$0x3]  ;;  %819 = vst.msk [vmem:[%s1097_s30 + $0x38] ss:$4 sm:$0x3] %vm1082_vm0, %v268_v30  ;;  %v330_v53 = vcombine.low %v320_v42, %v327_v45  ;;  %v338_v54 = vrot.slane %v328_v46, %v1099_v26  ;;  %v331_v55 = vcombine.high %v320_v42, %v327_v45  ;;  %v345_v56 = vrot.slane %v329_v47, %v1099_v26 }
  0x2a   : > { %v825_v43 = vld [vmem:[%s1080_s27 + $0x29] ss:$4 sm:$0x3]  ;;  %v826_v44 = vld [vmem:[%s1080_s27 + $0x31] ss:$4 sm:$0x3] }
  0x2b   : > { %v827_v48 = vld [vmem:[%s1080_s27 + $0x39] ss:$4 sm:$0x3]  ;;  %v382_v49 = vmul.f32 4.464286, %v820_v33  ;;  %v352_v60 = vrot.slane %v330_v53, %v1099_v26  ;;  %v359_v61 = vrot.slane %v331_v55, %v1099_v26 }
  0x2c   : > { %v383_v50 = vmul.f32 4.464286, %v821_v35  ;;  %v384_v51 = vmul.f32 4.464286, %v822_v36  ;;  %v385_v52 = vmul.f32 4.464286, %v823_v40 }
  0x2d   : > { %v386_v57 = vmul.f32 4.464286, %v824_v41  ;;  %v387_v58 = vmul.f32 4.464286, %v825_v43  ;;  %v388_v59 = vmul.f32 4.464286, %v826_v44  ;;  %v360_v3 = vcombine.low %v338_v54, %v352_v60 }
  0x2e   : > { %v389_v62 = vmul.f32 4.464286, %v827_v48  ;;  %v390_v63 = vadd.f32 -2.0357144, %v382_v49  ;;  %v391_v0 = vadd.f32 -2.0357144, %v383_v50  ;;  %v361_v5 = vcombine.low %v345_v56, %v359_v61 }
  0x2f   : > { %v392_v1 = vadd.f32 -2.0357144, %v384_v51  ;;  %v393_v2 = vadd.f32 -2.0357144, %v385_v52  ;;  %v394_v6 = vadd.f32 -2.0357144, %v386_v57  ;;  %364 = vst [vmem:[%s1160_s5] sm:$0xff] %v360_v3 }
  0x30   : > { %v395_v7 = vadd.f32 -2.0357144, %v387_v58  ;;  %v838_v8 = vld [vmem:[%s1080_s27 + $0x2] ss:$4 sm:$0x3]  ;;  %v422_v11 = vcombine.low %v390_v63, %v391_v0  ;;  %365 = vst [vmem:[%s1160_s5 + $0x8] sm:$0xff] %v361_v5 }
  0x31   : > { %828 = vst.msk [vmem:[%s1097_s30 + $0x1] ss:$4 sm:$0x3] %vm1082_vm0, %v390_v63  ;;  %v396_v9 = vadd.f32 -2.0357144, %v388_v59  ;;  %v423_v12 = vcombine.low %v392_v1, %v393_v2 }
  0x32   : > { %v397_v10 = vadd.f32 -2.0357144, %v389_v62  ;;  %829 = vst.msk [vmem:[%s1097_s30 + $0x9] ss:$4 sm:$0x3] %vm1082_vm0, %v391_v0  ;;  %v424_v13 = vcombine.low %v394_v6, %v395_v7  ;;  %v432_v17 = vrot.slane %v422_v11, %v1099_v26 }
  0x33   : > { %830 = vst.msk [vmem:[%s1097_s30 + $0x11] ss:$4 sm:$0x3] %vm1082_vm0, %v392_v1  ;;  %831 = vst.msk [vmem:[%s1097_s30 + $0x19] ss:$4 sm:$0x3] %vm1082_vm0, %v393_v2  ;;  %v439_v18 = vrot.slane %v423_v12, %v1099_v26 }
  0x34   : > { %v839_v14 = vld [vmem:[%s1080_s27 + $0xa] ss:$4 sm:$0x3]  ;;  %v840_v15 = vld [vmem:[%s1080_s27 + $0x12] ss:$4 sm:$0x3]  ;;  %v425_v16 = vcombine.low %v396_v9, %v397_v10  ;;  %v446_v21 = vrot.slane %v424_v13, %v1099_v26 }
  0x35   : > { %832 = vst.msk [vmem:[%s1097_s30 + $0x21] ss:$4 sm:$0x3] %vm1082_vm0, %v394_v6  ;;  %833 = vst.msk [vmem:[%s1097_s30 + $0x29] ss:$4 sm:$0x3] %vm1082_vm0, %v395_v7  ;;  %v454_v25 = vcombine.low %v432_v17, %v439_v18  ;;  %v455_v27 = vcombine.high %v432_v17, %v439_v18 }
  0x36   : > { %v841_v19 = vld [vmem:[%s1080_s27 + $0x1a] ss:$4 sm:$0x3]  ;;  %v842_v20 = vld [vmem:[%s1080_s27 + $0x22] ss:$4 sm:$0x3]  ;;  %v453_v24 = vrot.slane %v425_v16, %v1099_v26 }
  0x37   : > { %834 = vst.msk [vmem:[%s1097_s30 + $0x31] ss:$4 sm:$0x3] %vm1082_vm0, %v396_v9  ;;  %835 = vst.msk [vmem:[%s1097_s30 + $0x39] ss:$4 sm:$0x3] %vm1082_vm0, %v397_v10  ;;  %v464_v34 = vrot.slane %v454_v25, %v1099_v26  ;;  %v471_v36 = vrot.slane %v455_v27, %v1099_v26 }
  0x38   : > { %v843_v22 = vld [vmem:[%s1080_s27 + $0x2a] ss:$4 sm:$0x3]  ;;  %v844_v23 = vld [vmem:[%s1080_s27 + $0x32] ss:$4 sm:$0x3]  ;;  %v456_v33 = vcombine.low %v446_v21, %v453_v24  ;;  %v457_v35 = vcombine.high %v446_v21, %v453_v24 }
  0x39   : > { %v845_v28 = vld [vmem:[%s1080_s27 + $0x3a] ss:$4 sm:$0x3]  ;;  %v509_v29 = vmul.f32 4.4444447, %v838_v8 }
  0x3a   : > { %v510_v30 = vmul.f32 4.4444447, %v839_v14  ;;  %v511_v31 = vmul.f32 4.4444447, %v840_v15  ;;  %v512_v32 = vmul.f32 4.4444447, %v841_v19  ;;  %v478_v40 = vrot.slane %v456_v33, %v1099_v26 }
  0x3b   : > { %v513_v37 = vmul.f32 4.4444447, %v842_v20  ;;  %v514_v38 = vmul.f32 4.4444447, %v843_v22  ;;  %v515_v39 = vmul.f32 4.4444447, %v844_v23  ;;  %v485_v41 = vrot.slane %v457_v35, %v1099_v26 }
  0x3c   : > { %v516_v42 = vmul.f32 4.4444447, %v845_v28  ;;  %v517_v43 = vadd.f32 -1.8044444, %v509_v29  ;;  %v518_v44 = vadd.f32 -1.8044444, %v510_v30  ;;  %v486_v47 = vcombine.low %v464_v34, %v478_v40 }
  0x3d   : > { %v519_v45 = vadd.f32 -1.8044444, %v511_v31  ;;  %v520_v46 = vadd.f32 -1.8044444, %v512_v32  ;;  %v487_v48 = vcombine.low %v471_v36, %v485_v41  ;;  %v521_v49 = vadd.f32 -1.8044444, %v513_v37 }
  0x3e   : > { %v522_v50 = vadd.f32 -1.8044444, %v514_v38  ;;  %846 = vst.msk [vmem:[%s1097_s30 + $0x2] ss:$4 sm:$0x3] %vm1082_vm0, %v517_v43  ;;  %v549_v53 = vcombine.low %v517_v43, %v518_v44  ;;  %836 = vst [vmem:[%s1160_s5 + $0x10] sm:$0xff] %v486_v47 }
  0x3f   : > { %v523_v51 = vadd.f32 -1.8044444, %v515_v39  ;;  %v524_v52 = vadd.f32 -1.8044444, %v516_v42  ;;  %v550_v54 = vcombine.low %v519_v45, %v520_v46  ;;  %837 = vst [vmem:[%s1160_s5 + $0x18] sm:$0xff] %v487_v48 }
  0x40   : > { %847 = vst.msk [vmem:[%s1097_s30 + $0xa] ss:$4 sm:$0x3] %vm1082_vm0, %v518_v44  ;;  %848 = vst.msk [vmem:[%s1097_s30 + $0x12] ss:$4 sm:$0x3] %vm1082_vm0, %v519_v45  ;;  %v551_v55 = vcombine.low %v521_v49, %v522_v50  ;;  %v559_v57 = vrot.slane %v549_v53, %v1099_v26 }
  0x41   : > { %849 = vst.msk [vmem:[%s1097_s30 + $0x1a] ss:$4 sm:$0x3] %vm1082_vm0, %v520_v46  ;;  %850 = vst.msk [vmem:[%s1097_s30 + $0x22] ss:$4 sm:$0x3] %vm1082_vm0, %v521_v49  ;;  %v552_v56 = vcombine.low %v523_v51, %v524_v52  ;;  %v566_v58 = vrot.slane %v550_v54, %v1099_v26 }
  0x42   : > { %851 = vst.msk [vmem:[%s1097_s30 + $0x2a] ss:$4 sm:$0x3] %vm1082_vm0, %v522_v50  ;;  %852 = vst.msk [vmem:[%s1097_s30 + $0x32] ss:$4 sm:$0x3] %vm1082_vm0, %v523_v51  ;;  %v573_v59 = vrot.slane %v551_v55, %v1099_v26 }
  0x43   : > { %853 = vst.msk [vmem:[%s1097_s30 + $0x3a] ss:$4 sm:$0x3] %vm1082_vm0, %v524_v52  ;;  %v580_v60 = vrot.slane %v552_v56, %v1099_v26  ;;  %v581_v61 = vcombine.low %v559_v57, %v566_v58  ;;  %v582_v62 = vcombine.high %v559_v57, %v566_v58 }
  0x45   : > { %v583_v63 = vcombine.low %v573_v59, %v580_v60  ;;  %v591_v0 = vrot.slane %v581_v61, %v1099_v26  ;;  %v584_v1 = vcombine.high %v573_v59, %v580_v60  ;;  %v598_v2 = vrot.slane %v582_v62, %v1099_v26 }
  0x47   : > { %v605_v4 = vrot.slane %v583_v63, %v1099_v26  ;;  %v612_v3 = vrot.slane %v584_v1, %v1099_v26 }
  0x49   : > { %v613_v5 = vcombine.low %v591_v0, %v605_v4  ;;  %v614_v6 = vcombine.low %v598_v2, %v612_v3 }
  0x4b   : > { %854 = vst [vmem:[%s1160_s5 + $0x20] sm:$0xff] %v613_v5  ;;  %855 = vst [vmem:[%s1160_s5 + $0x28] sm:$0xff] %v614_v6 }
  0x4c   : > { %934 = shalt.err (!%p931_p5)
}
  0x4d   : > { %s935_s25 = scalar_lea.hbm %s1232_s12, 768  ;;  %s939_s28 = scalar_lea.hbm %s1286_s2, 1536 }
  0x4e   : > { %p936_p6 = scmp.ne.s32.totalorder %s1232_s12, %s935_s25  ;;  %p940_p10 = scmp.lt.u32.totalorder %s1232_s12, %s1286_s2 }
  0x4f   : > { %p941_p11 = scmp.lt.u32.totalorder %s939_s28, %s935_s25  ;;  %p943_p13 = scmp.lt.u32.totalorder %s935_s25, %s1232_s12 }
  0x50   : > { %p937_p7 = pnand %p936_p6, %p1060_p4 }
  0x51   : > { %p942_p12 = por %p941_p11, %p940_p10 }
  0x52   : > { %p938_p9 = pneg %p937_p7 }
  0x53   : > { %p944_p0 = por %p943_p13, %p942_p12 }
  0x55   : > { %p945_p1 = pnand %p944_p0, %p938_p9 }
  0x57   : > { %948 = shalt.err (!%p945_p1)
}
  0x58   : > { %s1003_s3 = smov 256   ;;  %s1004_s4 = smov 16  }
  0x59   : > { %863 = dma.vmem_to_hbm [thread:$0]  (%p1060_p4), %s1227_s7, 768, %s1232_s12, %s1238_s16, %s1003_s3, %s1003_s3, %s1004_s4  }
  0x5a PF: > { %p869_p2 = scmp.ge.s32.totalorder %s999_s14, 2  ;;  %s689_s5 = sand.u32 1, %s979_s9  }
  0x5b   : > { %s690_s6 = scalar_lea.sflag [#allocation3], %s689_s5 }
  0x5c   : > { %p866_p3 = pnand %p869_p2, %p1067_p8 }
  0x5e   : > { %974 = dma.done.wait (!%p866_p3), %s690_s6, 768  }
  0x5f   : > { %976 = vsyncadd (!%p866_p3), %s690_s6, 4294966528  ;;  %s16_s14 = sadd.s32 1, %s999_s14   ;;  %s1291_s9 = smov %s983_s10 }
  0x60   : > { %p13_p5 = scmp.ge.s32.totalorder %s16_s14, 4   ;;  %s1292_s10 = smov %s987_s11 }
  0x61   : > { %s1293_s11 = smov %s1073_s22  ;;  %s1294_s12 = smov %s995_s13 }
  0x62   : > { %s1295_s13 = smov %s1297_s17  ;;  %15 = sbr.rel (!%p13_p5) target bundleno = 4 (0x4), region = 119 }
  0x69   :  { %695 = vsyncpa [#allocation3], 1 }
  0x6a   :  { %697 = vsyncpa [#allocation3 + $0x1], 1 }

</bundles_post_ra>
